<compile_context>
chip_gen: v5e
topology: v5e:2x2
jax: 0.10.0
libtpu: 0.0.40
codegen_flags: <defaults>
</compile_context>

<pallas_src>
import functools

import jax
import jax.numpy as jnp
from jax import lax
from jax.experimental import pallas as pl
from jax.experimental.pallas import tpu as pltpu


def _round_up(a, b):
    return ((a + b - 1) // b) * b


def _vmem_limit(required_bytes):
    """Generation-aware scoped-VMEM limit sized from the tile footprint."""
    cap = 64 * 1024 * 1024
    try:
        cap = int(pltpu.get_tpu_info().vmem_capacity_bytes)
    except Exception:
        pass
    headroom = (cap * 3) // 4          # leave >=25% for compiler-internal scratch
    return int(min(max(2 * required_bytes, 32 * 1024 * 1024), headroom))


# ---------------------------------------------------------------------------
# Stage 1: per-head fused Q/K/V projection (Q pre-scaled by 1/sqrt(d_k)).
# ---------------------------------------------------------------------------
def _qkv_proj_kernel(x_ref, w_ref, b_ref, q_ref, k_ref, v_ref, qkv_scr, *,
                     d_k, compute_dtype):
    x = x_ref[0]                                                      # (ts, D)
    qkv = jnp.dot(x, w_ref[0], preferred_element_type=jnp.float32)    # (ts, 3dk)
    qkv_scr[...] = (qkv + b_ref[0]).astype(compute_dtype)
    q_ref[0, 0] = qkv_scr[:, :d_k]
    k_ref[0, 0] = qkv_scr[:, d_k:2 * d_k]
    v_ref[0, 0] = qkv_scr[:, 2 * d_k:]


# ---------------------------------------------------------------------------
# Stage 2: flash attention with fused output projection over heads.
# ---------------------------------------------------------------------------
def _flash_attn_kernel(q_ref, k_ref, v_ref, wo_ref, bo_ref, o_ref,
                       m_scr, l_scr, acc_scr, oacc_scr, *,
                       seq_len, kv_tile, mask_kv, compute_dtype):
    h = pl.program_id(2)
    ki = pl.program_id(3)
    last_h = pl.num_programs(2) - 1
    last_k = pl.num_programs(3) - 1

    # One-time (per (batch, q_block)) init of the output accumulator with bo.
    @pl.when((h == 0) & (ki == 0))
    def _():
        oacc_scr[...] = jnp.broadcast_to(
            bo_ref[...].astype(jnp.float32), oacc_scr.shape)

    # Per-(q_block, head) init of the online-softmax state.
    @pl.when(ki == 0)
    def _():
        m_scr[...] = jnp.full_like(m_scr, -jnp.inf)
        l_scr[...] = jnp.zeros_like(l_scr)
        acc_scr[...] = jnp.zeros_like(acc_scr)

    q = q_ref[0, 0]                                                   # (tq, dk)
    k = k_ref[0, 0]                                                   # (tk, dk)
    v = v_ref[0, 0]                                                   # (tk, dk)

    # Scores: contract over d_k without materializing k.T.            (tq, tk)
    s = lax.dot_general(q, k, (((1,), (1,)), ((), ())),
                        preferred_element_type=jnp.float32)

    if mask_kv:  # static: padded KV columns get a large negative score
        col = ki * kv_tile + lax.broadcasted_iota(jnp.int32, s.shape, 1)
        s = jnp.where(col < seq_len, s, -1e9)

    # Online softmax (always f32).
    m_prev = m_scr[...]
    m_new = jnp.maximum(m_prev, jnp.max(s, axis=-1, keepdims=True))
    alpha = jnp.exp(m_prev - m_new)
    p = jnp.exp(s - m_new)
    l_scr[...] = alpha * l_scr[...] + jnp.sum(p, axis=-1, keepdims=True)
    acc_scr[...] = alpha * acc_scr[...] + jnp.dot(
        p.astype(compute_dtype), v, preferred_element_type=jnp.float32)
    m_scr[...] = m_new

    # Head epilogue: normalize (exact divide, off the hot loop) and fold this
    # head into the output projection accumulator.
    @pl.when(ki == last_k)
    def _():
        head_out = (acc_scr[...] / l_scr[...]).astype(compute_dtype)  # (tq, dk)
        oacc_scr[...] += jnp.dot(head_out, wo_ref[0],
                                 preferred_element_type=jnp.float32)

    # Final write after the last head's last KV step.
    @pl.when((h == last_h) & (ki == last_k))
    def _():
        o_ref[0] = oacc_scr[...].astype(o_ref.dtype)


# ---------------------------------------------------------------------------
# Host-side wrapper.
# ---------------------------------------------------------------------------
def attention_forward(x, params, n_heads, *, compute_dtype=jnp.bfloat16,
                      q_block=256, kv_block=512):
    """x: (B, S, D).  params: dict with wq,bq,wk,bk,wv,bv,wo,bo ((in,out) weights)."""
    B, S, D = x.shape
    assert D % n_heads == 0
    d_k = D // n_heads
    scale = 1.0 / (d_k ** 0.5)
    H = n_heads

    # ---- host-side weight packing ------------------------------------------
    def per_head_cols(w):   # (D, D) -> (H, D, d_k)
        return w.reshape(D, H, d_k).transpose(1, 0, 2)

    def per_head_bias(b):   # (1, D) -> (H, 1, d_k)
        return b.reshape(1, H, d_k).transpose(1, 0, 2)

    w_qkv = jnp.concatenate(
        [per_head_cols(params["wq"] * scale),
         per_head_cols(params["wk"]),
         per_head_cols(params["wv"])], axis=-1).astype(compute_dtype)   # (H,D,3dk)
    b_qkv = jnp.concatenate(
        [per_head_bias(params["bq"] * scale),
         per_head_bias(params["bk"]),
         per_head_bias(params["bv"])], axis=-1).astype(jnp.float32)     # (H,1,3dk)
    wo = params["wo"].reshape(H, d_k, D).astype(compute_dtype)          # (H,dk,D)
    bo = params["bo"].astype(jnp.float32)                               # (1,D)

    # ---- tiling / padding (no tq=tk=S fallback) ------------------------------
    s8 = _round_up(S, 8)
    tq = min(q_block, s8)
    tk = min(kv_block, s8)
    if (tq % tk != 0) and (tk % tq != 0):
        tk = tq
    S_pad = _round_up(S, max(tq, tk))
    ts = max(tq, tk)                      # projection-kernel seq tile
    n_sp, n_q, n_k = S_pad // ts, S_pad // tq, S_pad // tk
    mask_kv = (S_pad != S)

    x_pad = x
    if mask_kv:
        x_pad = jnp.pad(x, ((0, 0), (0, S_pad - S), (0, 0)))
    x_pad = x_pad.astype(compute_dtype)   # halve the dominant HBM stream

    w_isz = jnp.dtype(compute_dtype).itemsize
    o_isz = jnp.dtype(x.dtype).itemsize

    # ---- stage 1: Q/K/V projection -------------------------------------------
    proj_req = (2 * ts * D * w_isz                  # x double buffer
                + 2 * D * 3 * d_k * w_isz           # w_qkv double buffer
                + 2 * 3 * d_k * 4                   # b_qkv
                + 3 * 2 * ts * d_k * w_isz          # q/k/v output double buffers
                + ts * 3 * d_k * w_isz)             # scratch
    proj_cost = pl.CostEstimate(
        flops=2 * B * S_pad * D * 3 * D,
        transcendentals=0,
        bytes_accessed=(B * S_pad * D * w_isz
                        + B * n_sp * 3 * D * D * w_isz
                        + 3 * B * S_pad * D * w_isz),
    )
    qkv_shape = jax.ShapeDtypeStruct((B, H, S_pad, d_k), compute_dtype)
    q, k, v = pl.pallas_call(
        functools.partial(_qkv_proj_kernel, d_k=d_k, compute_dtype=compute_dtype),
        out_shape=(qkv_shape, qkv_shape, qkv_shape),
        grid_spec=pltpu.PrefetchScalarGridSpec(
            num_scalar_prefetch=0,
            grid=(B, n_sp, H),
            in_specs=[
                pl.BlockSpec((1, ts, D), lambda b, si, h: (b, si, 0)),        # x
                pl.BlockSpec((1, D, 3 * d_k), lambda b, si, h: (h, 0, 0)),    # w_qkv
                pl.BlockSpec((1, 1, 3 * d_k), lambda b, si, h: (h, 0, 0)),    # b_qkv
            ],
            out_specs=[
                pl.BlockSpec((1, 1, ts, d_k), lambda b, si, h: (b, h, si, 0)),
                pl.BlockSpec((1, 1, ts, d_k), lambda b, si, h: (b, h, si, 0)),
                pl.BlockSpec((1, 1, ts, d_k), lambda b, si, h: (b, h, si, 0)),
            ],
            scratch_shapes=[pltpu.VMEM((ts, 3 * d_k), compute_dtype)],
        ),
        compiler_params=pltpu.CompilerParams(
            dimension_semantics=("parallel", "parallel", "arbitrary"),
            vmem_limit_bytes=_vmem_limit(proj_req),
        ),
        cost_estimate=proj_cost,
    )(x_pad, w_qkv, b_qkv)

    # ---- stage 2: flash attention + fused output projection ------------------
    attn_req = (2 * tq * d_k * w_isz                # q double buffer
                + 4 * tk * d_k * w_isz              # k, v double buffers
                + 2 * d_k * D * w_isz               # wo double buffer
                + 2 * D * 4                         # bo
                + 2 * tq * D * o_isz                # output double buffer
                + 2 * tq * 4                        # m, l
                + tq * d_k * 4 + tq * D * 4)        # acc, oacc
    attn_cost = pl.CostEstimate(
        flops=4 * B * S_pad * S_pad * D + 2 * B * S_pad * D * D,
        transcendentals=B * H * S_pad * S_pad,
        bytes_accessed=(B * H * S_pad * d_k * w_isz                  # q (read once)
                        + 2 * B * n_q * H * S_pad * d_k * w_isz      # k, v per q-block
                        + B * n_q * H * d_k * D * w_isz              # wo per (q-block, head)
                        + B * S_pad * D * o_isz),                    # output
    )
    kernel = functools.partial(
        _flash_attn_kernel, seq_len=S, kv_tile=tk, mask_kv=mask_kv,
        compute_dtype=compute_dtype)

    out = pl.pallas_call(
        kernel,
        out_shape=jax.ShapeDtypeStruct((B, S_pad, D), x.dtype),
        grid_spec=pltpu.PrefetchScalarGridSpec(
            num_scalar_prefetch=0,
            grid=(B, n_q, H, n_k),
            in_specs=[
                pl.BlockSpec((1, 1, tq, d_k), lambda b, qi, h, ki: (b, h, qi, 0)),
                pl.BlockSpec((1, 1, tk, d_k), lambda b, qi, h, ki: (b, h, ki, 0)),
                pl.BlockSpec((1, 1, tk, d_k), lambda b, qi, h, ki: (b, h, ki, 0)),
                pl.BlockSpec((1, d_k, D), lambda b, qi, h, ki: (h, 0, 0)),
                pl.BlockSpec((1, D), lambda b, qi, h, ki: (0, 0)),
            ],
            out_specs=pl.BlockSpec((1, tq, D), lambda b, qi, h, ki: (b, qi, 0)),
            scratch_shapes=[
                pltpu.VMEM((tq, 1), jnp.float32),    # m (row max)
                pltpu.VMEM((tq, 1), jnp.float32),    # l (row sum)
                pltpu.VMEM((tq, d_k), jnp.float32),  # P @ V accumulator
                pltpu.VMEM((tq, D), jnp.float32),    # output-projection accumulator
            ],
        ),
        compiler_params=pltpu.CompilerParams(
            dimension_semantics=("parallel", "parallel", "arbitrary", "arbitrary"),
            vmem_limit_bytes=_vmem_limit(attn_req),
        ),
        cost_estimate=attn_cost,
    )(q, k, v, wo, bo)

    if mask_kv:
        out = out[:, :S, :]
    return out


# ---------------------------------------------------------------------------
# Parameter init + plain-JAX reference (matches the PyTorch module).
# ---------------------------------------------------------------------------
def init_params(key, d_model):
    """Deterministic init mimicking nn.Linear default (uniform +-1/sqrt(in))."""
    bound = 1.0 / (d_model ** 0.5)
    keys = jax.random.split(key, 8)
    params = {}
    for i, n in enumerate(["q", "k", "v", "o"]):
        # stored already transposed: (in_features, out_features)
        params["w" + n] = jax.random.uniform(
            keys[2 * i], (d_model, d_model), jnp.float32, -bound, bound)
        params["b" + n] = jax.random.uniform(
            keys[2 * i + 1], (1, d_model), jnp.float32, -bound, bound)
    return params


def reference_forward(x, params, n_heads):
    B, S, D = x.shape
    d_k = D // n_heads
    q = x @ params["wq"] + params["bq"]
    k = x @ params["wk"] + params["bk"]
    v = x @ params["wv"] + params["bv"]

    def split(t):  # (B,S,D) -> (B,H,S,dk)
        return t.reshape(B, S, n_heads, d_k).transpose(0, 2, 1, 3)

    qh, kh, vh = split(q), split(k), split(v)
    s = jnp.einsum("bhqd,bhkd->bhqk", qh, kh) / (d_k ** 0.5)
    p = jax.nn.softmax(s, axis=-1)
    o = jnp.einsum("bhqk,bhkd->bhqd", p, vh)
    o = o.transpose(0, 2, 1, 3).reshape(B, S, D)
    return o @ params["wo"] + params["bo"]


if __name__ == "__main__":
    batch, seq, d_model, n_heads = 2, 8, 32, 4

    key = jax.random.PRNGKey(0)
    k_param, k_x = jax.random.split(key)
    params = init_params(k_param, d_model)
    x = jax.random.normal(k_x, (batch, seq, d_model), jnp.float32)

    ref = reference_forward(x, params, n_heads)

    # Full-precision path (tight check).
    out_f32 = jax.block_until_ready(
        attention_forward(x, params, n_heads, compute_dtype=jnp.float32))
    assert out_f32.shape == (batch, seq, d_model)
    assert jnp.allclose(out_f32, ref, atol=2e-3, rtol=2e-3), "f32 mismatch"

    # Default bf16-MXU path (f32 accumulation / f32 softmax; looser check).
    out_bf16 = jax.block_until_ready(
        attention_forward(x, params, n_heads, compute_dtype=jnp.bfloat16))
    assert out_bf16.shape == (batch, seq, d_model)
    assert jnp.allclose(out_bf16, ref, atol=5e-2, rtol=5e-2), "bf16 mismatch"

    # Ragged-S path: exercises padding + padded-KV-column masking.
    seq2 = 40
    x2 = jax.random.normal(jax.random.PRNGKey(1), (batch, seq2, d_model),
                           jnp.float32)
    ref2 = reference_forward(x2, params, n_heads)
    out2 = jax.block_until_ready(
        attention_forward(x2, params, n_heads, compute_dtype=jnp.float32,
                          q_block=16, kv_block=32))
    assert out2.shape == (batch, seq2, d_model)
    assert jnp.allclose(out2, ref2, atol=2e-3, rtol=2e-3), "ragged mismatch"

    print("KERNEL_OK")
</pallas_src>

<mosaic_0001>
module attributes {stable_mosaic.version = 11 : i64} {
  func.func @_qkv_proj_kernel(%arg0: i32, %arg1: i32, %arg2: i32, %arg3: memref<1x8x32xf32, #tpu.memory_space<vmem>>, %arg4: memref<1x32x24xf32, #tpu.memory_space<vmem>>, %arg5: memref<1x1x24xf32, #tpu.memory_space<vmem>>, %arg6: memref<1x1x8x8xf32, #tpu.memory_space<vmem>>, %arg7: memref<1x1x8x8xf32, #tpu.memory_space<vmem>>, %arg8: memref<1x1x8x8xf32, #tpu.memory_space<vmem>>, %arg9: memref<8x24xf32, #tpu.memory_space<vmem>>) attributes {dimension_semantics = [#tpu.dimension_semantics<parallel>, #tpu.dimension_semantics<parallel>, #tpu.dimension_semantics<arbitrary>], iteration_bounds = array<i64: 2, 1, 4>, scalar_prefetch = 0 : i64, scratch_operands = 1 : i64, tpu.core_type = #tpu.core_type<tc>, window_params = [{transform_indices = @transform_0, window_bounds = array<i64: 1, 8, 32>}, {transform_indices = @transform_1, window_bounds = array<i64: 1, 32, 24>}, {transform_indices = @transform_2, window_bounds = array<i64: 1, 1, 24>}, {transform_indices = @transform_3, window_bounds = array<i64: 1, 1, 8, 8>}, {transform_indices = @transform_4, window_bounds = array<i64: 1, 1, 8, 8>}, {transform_indices = @transform_5, window_bounds = array<i64: 1, 1, 8, 8>}]} {
    %c0 = arith.constant 0 : index
    %c0_0 = arith.constant 0 : index
    %c0_1 = arith.constant 0 : index
    %0 = vector.load %arg3[%c0, %c0_0, %c0_1] : memref<1x8x32xf32, #tpu.memory_space<vmem>>, vector<1x8x32xf32>
    %1 = vector.shape_cast %0 : vector<1x8x32xf32> to vector<8x32xf32>
    %c0_2 = arith.constant 0 : index
    %c0_3 = arith.constant 0 : index
    %c0_4 = arith.constant 0 : index
    %2 = vector.load %arg4[%c0_2, %c0_3, %c0_4] : memref<1x32x24xf32, #tpu.memory_space<vmem>>, vector<1x32x24xf32>
    %3 = vector.shape_cast %2 : vector<1x32x24xf32> to vector<32x24xf32>
    %cst = arith.constant dense<0.000000e+00> : vector<8x24xf32>
    %4 = tpu.matmul %1, %3, %cst {dimension_numbers = #tpu.dot_dimension_numbers<[1], [0], [0], [1], [0, 0, 1, 1], [], []>} : vector<8x32xf32>, vector<32x24xf32>, vector<8x24xf32> -> vector<8x24xf32>
    %c0_5 = arith.constant 0 : index
    %c0_6 = arith.constant 0 : index
    %c0_7 = arith.constant 0 : index
    %5 = vector.load %arg5[%c0_5, %c0_6, %c0_7] : memref<1x1x24xf32, #tpu.memory_space<vmem>>, vector<1x1x24xf32>
    %6 = vector.shape_cast %5 : vector<1x1x24xf32> to vector<1x24xf32>
    %7 = vector.broadcast %6 : vector<1x24xf32> to vector<8x24xf32>
    %8 = arith.addf %4, %7 : vector<8x24xf32>
    %c0_8 = arith.constant 0 : index
    %c0_9 = arith.constant 0 : index
    %9 = vector.load %arg9[%c0_8, %c0_9] : memref<8x24xf32, #tpu.memory_space<vmem>>, vector<8x24xf32>
    tpu.vector_store %arg9[%c0_8, %c0_9], %8 {strides = array<i32>} : memref<8x24xf32, #tpu.memory_space<vmem>>, vector<8x24xf32>,
    %c0_10 = arith.constant 0 : index
    %c0_11 = arith.constant 0 : index
    %10 = vector.load %arg9[%c0_10, %c0_11] : memref<8x24xf32, #tpu.memory_space<vmem>>, vector<8x8xf32>
    %c0_12 = arith.constant 0 : index
    %c0_13 = arith.constant 0 : index
    %c0_14 = arith.constant 0 : index
    %c0_15 = arith.constant 0 : index
    %11 = vector.load %arg6[%c0_12, %c0_13, %c0_14, %c0_15] : memref<1x1x8x8xf32, #tpu.memory_space<vmem>>, vector<1x1x8x8xf32>
    %12 = vector.shape_cast %11 : vector<1x1x8x8xf32> to vector<8x8xf32>
    %13 = vector.shape_cast %10 : vector<8x8xf32> to vector<1x1x8x8xf32>
    tpu.vector_store %arg6[%c0_12, %c0_13, %c0_14, %c0_15], %13 {strides = array<i32>} : memref<1x1x8x8xf32, #tpu.memory_space<vmem>>, vector<1x1x8x8xf32>,
    %c0_16 = arith.constant 0 : index
    %c8 = arith.constant 8 : index
    %14 = vector.load %arg9[%c0_16, %c8] : memref<8x24xf32, #tpu.memory_space<vmem>>, vector<8x8xf32>
    %c0_17 = arith.constant 0 : index
    %c0_18 = arith.constant 0 : index
    %c0_19 = arith.constant 0 : index
    %c0_20 = arith.constant 0 : index
    %15 = vector.load %arg7[%c0_17, %c0_18, %c0_19, %c0_20] : memref<1x1x8x8xf32, #tpu.memory_space<vmem>>, vector<1x1x8x8xf32>
    %16 = vector.shape_cast %15 : vector<1x1x8x8xf32> to vector<8x8xf32>
    %17 = vector.shape_cast %14 : vector<8x8xf32> to vector<1x1x8x8xf32>
    tpu.vector_store %arg7[%c0_17, %c0_18, %c0_19, %c0_20], %17 {strides = array<i32>} : memref<1x1x8x8xf32, #tpu.memory_space<vmem>>, vector<1x1x8x8xf32>,
    %c0_21 = arith.constant 0 : index
    %c16 = arith.constant 16 : index
    %18 = vector.load %arg9[%c0_21, %c16] : memref<8x24xf32, #tpu.memory_space<vmem>>, vector<8x8xf32>
    %c0_22 = arith.constant 0 : index
    %c0_23 = arith.constant 0 : index
    %c0_24 = arith.constant 0 : index
    %c0_25 = arith.constant 0 : index
    %19 = vector.load %arg8[%c0_22, %c0_23, %c0_24, %c0_25] : memref<1x1x8x8xf32, #tpu.memory_space<vmem>>, vector<1x1x8x8xf32>
    %20 = vector.shape_cast %19 : vector<1x1x8x8xf32> to vector<8x8xf32>
    %21 = vector.shape_cast %18 : vector<8x8xf32> to vector<1x1x8x8xf32>
    tpu.vector_store %arg8[%c0_22, %c0_23, %c0_24, %c0_25], %21 {strides = array<i32>} : memref<1x1x8x8xf32, #tpu.memory_space<vmem>>, vector<1x1x8x8xf32>,
    return
  }
  func.func @transform_0(%arg0: i32, %arg1: i32, %arg2: i32) -> (i32, i32, i32) {
    %c0_i32 = arith.constant 0 : i32
    %c0_i32_0 = arith.constant 0 : i32
    return %arg0, %arg1, %c0_i32 : i32, i32, i32
  }
  func.func @transform_1(%arg0: i32, %arg1: i32, %arg2: i32) -> (i32, i32, i32) {
    %c0_i32 = arith.constant 0 : i32
    %c0_i32_0 = arith.constant 0 : i32
    %c0_i32_1 = arith.constant 0 : i32
    return %arg2, %c0_i32, %c0_i32_0 : i32, i32, i32
  }
  func.func @transform_2(%arg0: i32, %arg1: i32, %arg2: i32) -> (i32, i32, i32) {
    %c0_i32 = arith.constant 0 : i32
    %c0_i32_0 = arith.constant 0 : i32
    %c0_i32_1 = arith.constant 0 : i32
    return %arg2, %c0_i32, %c0_i32_0 : i32, i32, i32
  }
  func.func @transform_3(%arg0: i32, %arg1: i32, %arg2: i32) -> (i32, i32, i32, i32) {
    %c0_i32 = arith.constant 0 : i32
    %c0_i32_0 = arith.constant 0 : i32
    return %arg0, %arg2, %arg1, %c0_i32 : i32, i32, i32, i32
  }
  func.func @transform_4(%arg0: i32, %arg1: i32, %arg2: i32) -> (i32, i32, i32, i32) {
    %c0_i32 = arith.constant 0 : i32
    %c0_i32_0 = arith.constant 0 : i32
    return %arg0, %arg2, %arg1, %c0_i32 : i32, i32, i32, i32
  }
  func.func @transform_5(%arg0: i32, %arg1: i32, %arg2: i32) -> (i32, i32, i32, i32) {
    %c0_i32 = arith.constant 0 : i32
    %c0_i32_0 = arith.constant 0 : i32
    return %arg0, %arg2, %arg1, %c0_i32 : i32, i32, i32, i32
  }
}

</mosaic_0001>

<bundles_post_ra>
// kernel: tpu_custom_call.1
= control target key start
LH: loop header
LB: loop body
LE: loop exit
PB: predicated region body
PF: predicated region fallthrough
CT: control target
= control target key end

     0   :  { %s1074_s0 = inlined_call_operand.vmem [shape: f32[2,8,32], index: 0, kind: input, shape index: {}]   ;;  %s1075_s1 = inlined_call_operand.vmem [shape: f32[4,32,24], index: 1, kind: input, shape index: {}]   ;;  %s1076_s2 = inlined_call_operand.vmem [shape: f32[4,1,24], index: 2, kind: input, shape index: {}]   ;;  %s1077_s3 = inlined_call_operand.hbm [shape: f32[2,4,8,8], index: 3, kind: output, shape index: {0}]   ;;  %s1078_s4 = inlined_call_operand.hbm [shape: f32[2,4,8,8], index: 4, kind: output, shape index: {1}]   ;;  %s1079_s5 = inlined_call_operand.hbm [shape: f32[2,4,8,8], index: 5, kind: output, shape index: {2}]  }
   0x1   :  { %1083 = sst [smem:[#allocation11_spill]] %s1074_s0 }
   0x2   :  { %1084 = sst [smem:[#allocation12_spill]] %s1075_s1 }
   0x3   :  { %11 = vsyncpa [#allocation4], 0 }
   0x4   :  { %13 = vsyncpa [#allocation4 + $0x1], 0 }
   0x5   :  { %14 = vsyncpa [#allocation6], 0 }
   0x6   :  { %16 = vsyncpa [#allocation6 + $0x1], 0  ;;  %s892_s18 = smov 0   ;;  %s894_s19 = smov 0  }
   0x7   :  { %s896_s20 = smov 0   ;;  %s898_s21 = smov 0  }
   0x8   :  { %s900_s22 = smov 0   ;;  %s902_s23 = smov 0  }
   0x9   :  { %s904_s24 = smov 0   ;;  %s906_s25 = smov 0  }
   0xa LB: > { %s1081_s26 = sadd.s32 4294967295, %s858_s25   ;;  %s1080_s27 = sadd.s32 4294967294, %s858_s25   ;;  %s858_s25 = sphi %s906_s25, %s22_s25   ;;  %s854_s24 = sphi %s904_s24, %s1099_s24   ;;  %s850_s23 = sphi %s902_s23, %s1098_s23   ;;  %s846_s22 = sphi %s900_s22, %s1097_s22   ;;  %s842_s21 = sphi %s898_s21, %s1096_s21   ;;  %s838_s20 = sphi %s896_s20, %s1095_s20   ;;  %s834_s19 = sphi %s894_s19, %s1094_s19   ;;  %s830_s18 = sphi %s892_s18, %s1093_s18  }
   0xb   : > { %s34_s28 = sadd.s32 1, %s850_s23  ;;  %s41_s29 = sadd.s32 1, %s854_s24 }
   0xc   : > { %p35_p0 = scmp.ge.s32.totalorder %s34_s28, 4  ;;  %p142_p1 = scmp.ne.s32.totalorder %s838_s20, %s834_s19 }
   0xd   : > { %p143_p2 = scmp.eq.s32.totalorder %s1081_s26, 7  ;;  %p148_p5 = scmp.ne.s32.totalorder %s834_s19, %s830_s18 }
   0xe   : > { %s1101_s28 = smov (%p35_p0, %s34_s28), 0  ;;  %s1103_s29 = smov (!%p35_p0, %s41_s29), %s854_s24 }
   0xf   : > { %s126_s30 = ssub.s32 %s850_s23, %s1101_s28  ;;  %p945_p3 = por %p143_p2, %p142_p1 }
  0x10   : > { %p43_p4 = scmp.ge.s32.totalorder %s1103_s29, 2  ;;  %p149_p6 = scmp.eq.s32.totalorder %s1080_s27, 7 }
  0x11   : > { %p600_p7 = scmp.ge.s32.totalorder %s858_s25, 1  ;;  %p251_p9 = scmp.lt.s32.totalorder %s858_s25, 9 }
  0x12   : > { %s1105_s29 = smov (%p43_p4, %s1103_s29), 0  ;;  %p956_p8 = por %p149_p6, %p148_p5 }
  0x13   : > { %1086 = sst [smem:[#allocation10_spill]] %s1105_s29  ;;  %s125_s8 = ssub.s32 %s854_s24, %s1105_s29 }
  0x14   : > { %s132_s9 = sadd.s32 1, %s838_s20  ;;  %s127_s10 = sor.u32 %s126_s30, %s125_s8 }
  0x15   : > { %p252_p10 = pnand %p600_p7, %p251_p9  ;;  %p130_p11 = scmp.eq.s32.totalorder %s127_s10, 0 }
  0x16   : > { %p306_p12 = scmp.lt.s32.totalorder (!%p252_p10), %s842_s21, 3  ;;  %p299_p13 = scmp.lt.s32.totalorder (!%p252_p10), %s846_s22, 1 }
  0x17   : > { %s965_s11 = scalar_select %p130_p11, %s838_s20, %s132_s9  }
  0x18   : > { %255 = sbr.rel (%p252_p10) target bundleno = 308 (0x134), region = 32  ;;  %s1088_s1 = sld [smem:[#allocation12_spill]] (!%p252_p10) }
  0x19   : > { %s1089_s0 = sld [smem:[#allocation11_spill]] (!%p252_p10)  ;;  %s611_s27 = sshll.u32 (!%p252_p10), %s846_s22, 2 }
  0x1a   : > { %s724_s15 = scalar_lea.hbm (!%p252_p10), %s1077_s3, 64 }
  0x1d   : > { %s307_s12 = scalar_select %p306_p12, %s842_s21, 3  ;;  %vm323_vm0 = vcmask 261120   ;;  %vm347_vm1 = vcmask 195584   ;;  %vm350_vm2 = vcmask 64512  }
  0x1e   : > { %s300_s13 = scalar_select %p299_p13, %s846_s22, 1 }
  0x1f   : > { %s619_s14 = sshll.u32 %s307_s12, 5  ;;  %s313_s17 = scalar_lea.vmem %s1076_s2, %s307_s12 }
  0x20   : > { %s310_s8 = scalar_lea.vmem %s1088_s1, %s619_s14  ;;  %s604_s9 = sshll.u32 %s300_s13, 3  ;;  %v703_v5 = vld [vmem:[%s313_s17] ss:$0 sm:$0xff] }
  0x21   : > { %v318_v0 = vld [vmem:[%s310_s8 + $0x18] sm:$0xff]  ;;  %v317_v1 = vld [vmem:[%s310_s8 + $0x10] sm:$0xff]  ;;  %v316_v2 = vld [vmem:[%s310_s8 + $0x8] sm:$0xff]  ;;  %s305_s29 = scalar_lea.vmem %s1089_s0, %s604_s9  ;;  %s282_s12 = sand.u32 1, %s834_s19  }
  0x22   : > { %339 = vmatpush.msra.mxu0 %v318_v0  ;;  %v315_v3 = vld [vmem:[%s310_s8] sm:$0xff]  ;;  %s386_s13 = sadd.s32 %s842_s21, %s611_s27  ;;  %s983_s14 = sshll.u32 %s282_s12, 3 }
  0x23   : > { %v314_v4 = vld [vmem:[%s305_s29] sm:$0xff]  ;;  %s985_s26 = sshll.u32 %s386_s13, 3  ;;  %s284_s17 = scalar_lea.vmem [#allocation3], %s983_s14 }
  0x24   : > { %340 = vmatpush.msra.mxu0 %v317_v1  ;;  %s388_s16 = scalar_lea.hbm %s1077_s3, %s985_s26  ;;  %s390_s30 = sshll.u32 %s284_s17, 4  ;;  %s391_s30 = int_to_ptr.vmem [resolvable:$true] %s390_s30 }
  0x25   : > { %s392_s22 = sshll.u32 %s388_s16, 4  ;;  %s860_s8 = smov 120   ;;  %s393_s22 = int_to_ptr.hbm [resolvable:$true] %s392_s22 }
  0x26   : > { %341 = vmatpush.msra.mxu0 %v316_v2  ;;  %s365_s21 = scalar_lea.sflag [#allocation4], %s282_s12  ;;  %s718_s9 = sshra.s32 %s393_s22, 4  ;;  %s719_s9 = int_to_ptr.hbm [resolvable:$true] %s718_s9 }
  0x27   : > { %s720_s10 = scalar_lea.hbm %s719_s9, 8  ;;  %p725_p4 = scmp.lt.s32.totalorder %s719_s9, %s1077_s3 }
  0x28   : > { %342 = vmatpush.msra.mxu0 %v315_v3  ;;  %p721_p0 = scmp.ne.s32.totalorder %s719_s9, %s720_s10  ;;  %p726_p5 = scmp.lt.s32.totalorder %s724_s15, %s720_s10 }
  0x29   : > { %607 = vmatmul.msk.f32.vlgmr.msra.gmra.mxu0 %vm323_vm0, %v314_v4 }
  0x2a   : > { %p722_p1 = pnand %p721_p0, %p945_p3  ;;  %p727_p6 = por %p726_p5, %p725_p4 }
  0x2c   : > { %p723_p2 = pneg %p722_p1 }
  0x2e   : > { %p728_p7 = pnand %p727_p6, %p723_p2 }
  0xa6   : > { %v344_v6 = vpop.f32.mrf.mxu0 }
  0xa7   : > { %v345_v7 = vadd.f32 %v703_v5, %v344_v6 }
  0xa9   : > { %348 = vst.msk [vmem:[#allocation2] sm:$0xff] %vm347_vm1, %v345_v7 }
  0xb0   : > { %v352_v8 = vld [vmem:[#allocation2] sm:$0xff] }
  0xb1   : > { %354 = vrot.lane.b32.xlu0 %v352_v8, %s860_s8  ;;  %351 = vst.msk [vmem:[%s284_s17] sm:$0xff] %vm350_vm2, %v352_v8 }
  0xb2   : > { %731 = shalt.err (!%p728_p7)
}
  0xb3   : > { %620 = dma.vmem_to_hbm [thread:$0]  (%p945_p3), %s391_s30, 128, %s393_s22, %s365_s21  }
  0xb4   : > { %s861_s12 = smov 112   ;;  %s405_s8 = scalar_lea.hbm %s1078_s4, %s985_s26 }
  0xb5   : > { %s1090_s0 = sadd.s32 4294967295, %s858_s25   ;;  %s291_s10 = scalar_lea.vmem [#allocation5], %s983_s14 }
  0xb6   : > { %s1009_s9 = sand.u32 1, %s1090_s0   ;;  %s407_s27 = sshll.u32 %s291_s10, 4  ;;  %s408_s27 = int_to_ptr.vmem [resolvable:$true] %s407_s27 }
  0xb7   : > { %s409_s13 = sshll.u32 %s405_s8, 4  ;;  %s422_s21 = scalar_lea.hbm %s1079_s5, %s985_s26  ;;  %s410_s13 = int_to_ptr.hbm [resolvable:$true] %s409_s13 }
  0xb8   : > { %s370_s15 = scalar_lea.sflag [#allocation6], %s1009_s9  ;;  %s746_s29 = sshra.s32 %s410_s13, 4  ;;  %s747_s29 = int_to_ptr.hbm [resolvable:$true] %s746_s29 }
  0xb9   : > { %360 = vrot.lane.b32.xlu0 %v352_v8, %s861_s12  ;;  %s748_s12 = scalar_lea.hbm %s747_s29, 8  ;;  %s752_s8 = scalar_lea.hbm %s1078_s4, 64 }
  0xba   : > { %p749_p9 = scmp.ne.s32.totalorder %s747_s29, %s748_s12  ;;  %p753_p12 = scmp.lt.s32.totalorder %s747_s29, %s1078_s4 }
  0xbb   : > { %p754_p13 = scmp.lt.s32.totalorder %s752_s8, %s748_s12 }
  0xbc   : > { %p750_p10 = pnand %p749_p9, %p945_p3 }
  0xbd   : > { %p755_p0 = por %p754_p13, %p753_p12 }
  0xbe   : > { %p751_p11 = pneg %p750_p10 }
  0xc0   : > { %p756_p1 = pnand %p755_p0, %p751_p11 }
 0x123   : > { %v355_v9 = vpop.permute.xlu0 %354 }
 0x124   : > { %357 = vst.msk [vmem:[%s291_s10] sm:$0xff] %vm350_vm2, %v355_v9 }
 0x125   : > { %759 = shalt.err (!%p756_p1)
}
 0x126   : > { %621 = dma.vmem_to_hbm [thread:$0]  (%p945_p3), %s408_s27, 128, %s410_s13, %s370_s15  }
 0x127   : > { %s298_s26 = scalar_lea.vmem [#allocation7], %s983_s14  ;;  %s426_s30 = sshll.u32 %s422_s21, 4  ;;  %s427_s30 = int_to_ptr.hbm [resolvable:$true] %s426_s30 }
 0x128   : > { %s424_s10 = sshll.u32 %s298_s26, 4  ;;  %s774_s1 = sshra.s32 %s427_s30, 4  ;;  %s425_s10 = int_to_ptr.vmem [resolvable:$true] %s424_s10  ;;  %s775_s1 = int_to_ptr.hbm [resolvable:$true] %s774_s1 }
 0x129   : > { %s776_s22 = scalar_lea.hbm %s775_s1, 8  ;;  %s780_s16 = scalar_lea.hbm %s1079_s5, 64 }
 0x12a   : > { %p777_p2 = scmp.ne.s32.totalorder %s775_s1, %s776_s22  ;;  %p781_p6 = scmp.lt.s32.totalorder %s775_s1, %s1079_s5 }
 0x12b   : > { %v361_v10 = vpop.permute.xlu0 %360  ;;  %p782_p7 = scmp.lt.s32.totalorder %s780_s16, %s776_s22 }
 0x12c   : > { %363 = vst.msk [vmem:[%s298_s26] sm:$0xff] %vm350_vm2, %v361_v10  ;;  %p778_p4 = pnand %p777_p2, %p945_p3 }
 0x12d   : > { %p783_p9 = por %p782_p7, %p781_p6 }
 0x12e   : > { %p779_p5 = pneg %p778_p4 }
 0x130   : > { %p784_p10 = pnand %p783_p9, %p779_p5 }
 0x132   : > { %787 = shalt.err (!%p784_p10)
}
 0x133   : > { %622 = dma.vmem_to_hbm [thread:$0]  (%p945_p3), %s425_s10, 128, %s427_s30, %s370_s15  }
 0x134 PF: > { %p636_p11 = scmp.ge.s32.totalorder %s858_s25, 2  ;;  %s438_s13 = sand.u32 1, %s830_s18  }
 0x135   : > { %s439_s21 = scalar_lea.sflag [#allocation4], %s438_s13 }
 0x136   : > { %p627_p12 = pnand %p636_p11, %p956_p8 }
 0x138   : > { %p628_p13 = pneg %p627_p12 }
 0x13a   : > { %821 = dma.done.wait (%p628_p13), %s439_s21, 128  }
 0x13b   : > { %823 = vsyncadd (%p628_p13), %s439_s21, 4294967168  ;;  %s1091_s17 = sadd.s32 4294967294, %s858_s25  }
 0x13c   : > { %s448_s8 = sand.u32 1, %s1091_s17  }
 0x13d   : > { %s449_s0 = scalar_lea.sflag [#allocation6], %s448_s8 }
 0x13e   : > { %825 = dma.done.wait (%p628_p13), %s449_s0, 256  }
 0x13f   : > { %827 = vsyncadd (%p628_p13), %s449_s0, 4294967040  ;;  %s22_s25 = sadd.s32 1, %s858_s25   ;;  %s1092_s6 = sld [smem:[#allocation10_spill]] }
 0x140   : > { %p19_p3 = scmp.ge.s32.totalorder %s22_s25, 10   ;;  %s1093_s18 = smov %s834_s19 }
 0x141   : > { %s1094_s19 = smov %s838_s20  ;;  %s1095_s20 = smov %s965_s11 }
 0x142   : > { %s1096_s21 = smov %s850_s23  ;;  %s1097_s22 = smov %s854_s24 }
 0x143   : > { %s1098_s23 = smov %s1101_s28  ;;  %21 = sbr.rel (!%p19_p3) target bundleno = 10 (0xa), region = 105 }
 0x145   : > { %s1099_s24 = smov %s1092_s6 }
 0x148   :  { %465 = vsyncpa [#allocation4], 1 }
 0x149   :  { %467 = vsyncpa [#allocation4 + $0x1], 1 }
 0x14a   :  { %468 = vsyncpa [#allocation6], 1 }
 0x14b   :  { %470 = vsyncpa [#allocation6 + $0x1], 1 }

</bundles_post_ra>
